<compile_context>
chip_gen: v6e
topology: v6e:2x2x1
jax: 0.10.0
libtpu: 0.0.40
codegen_flags: <defaults>
</compile_context>

<pallas_src>
import jax
import jax.numpy as jnp
from jax.experimental import pallas as pl
from jax.experimental.pallas import tpu as pltpu


def _conv1x1_sigmoid_kernel(x_ref, w_ref, b_ref, o_ref):
    # x_ref: (Cin, T)   pixels on lanes, channels on sublanes
    # w_ref: (Cout, Cin)
    # b_ref: (Cout, 1)
    # o_ref: (Cout, T)  lane-dense output tile
    y = jnp.dot(w_ref[...], x_ref[...], preferred_element_type=jnp.float32)
    y = y + b_ref[...]                      # broadcast bias over the pixel axis
    # sigmoid's exp runs on the EUP (its own VLIW slot) -> effectively free
    # on a bandwidth-bound kernel.
    o_ref[...] = jax.nn.sigmoid(y).astype(o_ref.dtype)


def _vmem_capacity_bytes():
    """Per-TensorCore VMEM capacity; conservative fallback if query fails."""
    try:
        info = pltpu.get_tpu_info()
        cap = getattr(info, "vmem_capacity_bytes", None)
        if cap:
            return int(cap)
    except Exception:
        pass
    return 64 * 1024 * 1024  # v7x per-TC size (most restrictive generation)


def _choose_pixel_tile(HW, N, Cin, Cout, vmem_cap, hw_tile_target):
    """Pick the pixel-tile width (last, lane-dense block dim).

    Driven by a per-step byte budget (x tile + out tile) so double-buffered
    blocks fit comfortably in scoped VMEM on every generation, then capped so
    the grid keeps enough steps for pipelining / both v7x cores — but never
    shrunk below the ~2048-pixel per-step-overhead cliff.
    """
    bytes_per_pixel = 4 * (Cin + Cout)
    # ~1/6 of VMEM per step: double-buffered in+out stays ~1/3 of capacity.
    step_budget = min(16 * 1024 * 1024, vmem_cap // 6)
    t = step_budget // bytes_per_pixel
    t = min(t, hw_tile_target)
    t = max(128, (t // 128) * 128)

    min_total_steps = 8
    steps_per_image = pl.cdiv(min_total_steps, N)
    if steps_per_image > 1:
        cap = (HW // steps_per_image // 128) * 128
        if cap >= 2048:        # only split further when tiles stay big
            t = min(t, cap)

    if t >= HW:
        return HW              # full-extent block: always a legal shape
    return t                   # multiple of 128; ragged last block is masked


def output_layer_forward(x_nchw, weight, bias, *, hw_tile_target=65536,
                         out_dtype=None):
    """Equivalent of outputLayer.forward (Conv2d(inC, outC, k=1) + Sigmoid).

    x_nchw : (N, Cin, H, W) float32
    weight : (Cout, Cin) float32   (1x1 conv kernel; (Cout,Cin,1,1) accepted)
    bias   : (Cout,)     float32
    out_dtype: optional narrower output dtype (e.g. jnp.bfloat16) to halve
               output HBM traffic; defaults to x's dtype (matches PyTorch).
    returns: (N, Cout, H, W)
    """
    if weight.ndim == 4:  # (Cout, Cin, 1, 1) -> (Cout, Cin)
        weight = weight.reshape(weight.shape[0], weight.shape[1])

    N, Cin, H, W = x_nchw.shape
    Cout = weight.shape[0]
    HW = H * W
    out_dtype = x_nchw.dtype if out_dtype is None else out_dtype

    vmem_cap = _vmem_capacity_bytes()
    t_hw = _choose_pixel_tile(HW, N, Cin, Cout, vmem_cap, hw_tile_target)
    n_tiles = pl.cdiv(HW, t_hw)  # ragged last block handled by Pallas masking

    # Free reshape: NCHW is already (N, C, H*W) contiguous -> no transpose,
    # no padding pass, no output slice pass.
    x3 = x_nchw.reshape(N, Cin, HW)
    b_col = bias.reshape(Cout, 1)

    # VMEM limit: enough for double-buffered (x + out) tiles with headroom,
    # never exceeding ~3/4 of this generation's physical VMEM.
    tile_bytes = 4 * (Cin + Cout) * t_hw
    vmem_limit = max(32 * 1024 * 1024, 2 * tile_bytes + (4 << 20))
    vmem_limit = min(vmem_limit, (vmem_cap * 3) // 4)

    flops = 2 * N * HW * Cin * Cout
    transcendentals = N * HW * Cout
    bytes_accessed = 4 * N * HW * Cin + jnp.dtype(out_dtype).itemsize * N * HW * Cout \
        + 4 * (Cout * Cin + Cout)

    out3 = pl.pallas_call(
        _conv1x1_sigmoid_kernel,
        out_shape=jax.ShapeDtypeStruct((N, Cout, HW), out_dtype),
        grid_spec=pltpu.PrefetchScalarGridSpec(
            num_scalar_prefetch=0,
            grid=(N, n_tiles),
            in_specs=[
                # x: (Cin, t_hw) block, image axis squeezed out of the kernel
                pl.BlockSpec((pl.Squeezed(), Cin, t_hw), lambda n, i: (n, 0, i)),
                # weight / bias: full (tiny) arrays, resident every step
                pl.BlockSpec((Cout, Cin), lambda n, i: (0, 0)),
                pl.BlockSpec((Cout, 1), lambda n, i: (0, 0)),
            ],
            out_specs=pl.BlockSpec(
                (pl.Squeezed(), Cout, t_hw), lambda n, i: (n, 0, i)),
        ),
        compiler_params=pltpu.CompilerParams(
            # both axes independent -> shardable across v7x's two TensorCores
            dimension_semantics=("parallel", "parallel"),
            vmem_limit_bytes=int(vmem_limit),
        ),
        cost_estimate=pl.CostEstimate(
            flops=flops,
            transcendentals=transcendentals,
            bytes_accessed=int(bytes_accessed),
        ),
    )(x3, weight, b_col)

    # Free reshape back to NCHW (no transpose needed in this layout).
    return out3.reshape(N, Cout, H, W)


def _ref_forward(x_nchw, weight, bias):
    # Pure-JAX reference: 1x1 conv == einsum over channel dim, then sigmoid.
    y = jnp.einsum("nchw,oc->nohw", x_nchw, weight) + bias[None, :, None, None]
    return jax.nn.sigmoid(y)


if __name__ == "__main__":
    key = jax.random.PRNGKey(0)
    k_x, k_w, k_b = jax.random.split(key, 3)

    N, inC, outC, Hs, Ws = 2, 4, 8, 16, 16

    x = jax.random.normal(k_x, (N, inC, Hs, Ws), dtype=jnp.float32)
    # Deterministic synthetic parameters (Conv2d(inC, outC, kernel_size=1)
    # -> weight (outC, inC, 1, 1) squeezed to (outC, inC), bias (outC,)).
    fan_in = inC  # kernel_size=1
    bound = 1.0 / (fan_in ** 0.5)
    weight = jax.random.uniform(k_w, (outC, inC), jnp.float32, -bound, bound)
    bias = jax.random.uniform(k_b, (outC,), jnp.float32, -bound, bound)

    out = output_layer_forward(x, weight, bias)
    out = jax.block_until_ready(out)

    ref = _ref_forward(x, weight, bias)
    assert out.shape == (N, outC, Hs, Ws)
    assert jnp.allclose(out, ref, atol=1e-5, rtol=1e-5)

    # Also exercise a shape whose H*W does not divide the tile (ragged last
    # block path, no pad/slice passes).
    x2 = jax.random.normal(k_x, (1, inC, 24, 25), dtype=jnp.float32)  # HW=600
    out2 = jax.block_until_ready(
        output_layer_forward(x2, weight, bias, hw_tile_target=256))
    ref2 = _ref_forward(x2, weight, bias)
    assert jnp.allclose(out2, ref2, atol=1e-5, rtol=1e-5)

    print("KERNEL_OK")
</pallas_src>

<mosaic_0001>
module attributes {stable_mosaic.version = 11 : i64} {
  func.func @_conv1x1_sigmoid_kernel(%arg0: i32, %arg1: i32, %arg2: memref<1x4x256xf32, #tpu.memory_space<vmem>>, %arg3: memref<8x4xf32, #tpu.memory_space<vmem>>, %arg4: memref<8x1xf32, #tpu.memory_space<vmem>>, %arg5: memref<1x8x256xf32, #tpu.memory_space<vmem>>) attributes {dimension_semantics = [#tpu.dimension_semantics<parallel>, #tpu.dimension_semantics<parallel>], iteration_bounds = array<i64: 2, 1>, scalar_prefetch = 0 : i64, scratch_operands = 0 : i64, tpu.core_type = #tpu.core_type<tc>, window_params = [{transform_indices = @transform_0, window_bounds = array<i64: 1, 4, 256>}, {pipeline_mode = #tpu.pipeline_mode<synchronous>, transform_indices = @transform_1, window_bounds = array<i64: 8, 4>}, {pipeline_mode = #tpu.pipeline_mode<synchronous>, transform_indices = @transform_2, window_bounds = array<i64: 8, 1>}, {transform_indices = @transform_3, window_bounds = array<i64: 1, 8, 256>}]} {
    %c0 = arith.constant 0 : index
    %c0_0 = arith.constant 0 : index
    %0 = vector.load %arg3[%c0, %c0_0] : memref<8x4xf32, #tpu.memory_space<vmem>>, vector<8x4xf32>
    %c0_1 = arith.constant 0 : index
    %c0_2 = arith.constant 0 : index
    %c0_3 = arith.constant 0 : index
    %1 = vector.load %arg2[%c0_1, %c0_2, %c0_3] : memref<1x4x256xf32, #tpu.memory_space<vmem>>, vector<1x4x256xf32>
    %2 = vector.shape_cast %1 : vector<1x4x256xf32> to vector<4x256xf32>
    %cst = arith.constant dense<0.000000e+00> : vector<8x256xf32>
    %3 = tpu.matmul %0, %2, %cst {dimension_numbers = #tpu.dot_dimension_numbers<[1], [0], [0], [1], [0, 0, 1, 1], [], []>} : vector<8x4xf32>, vector<4x256xf32>, vector<8x256xf32> -> vector<8x256xf32>
    %c0_4 = arith.constant 0 : index
    %c0_5 = arith.constant 0 : index
    %4 = vector.load %arg4[%c0_4, %c0_5] : memref<8x1xf32, #tpu.memory_space<vmem>>, vector<8x1xf32>
    %5 = vector.broadcast %4 : vector<8x1xf32> to vector<8x256xf32>
    %6 = arith.addf %3, %5 : vector<8x256xf32>
    %7 = arith.negf %6 : vector<8x256xf32>
    %8 = math.exp %7 : vector<8x256xf32>
    %cst_6 = arith.constant 1.000000e+00 : f32
    %9 = vector.broadcast %cst_6 : f32 to vector<8x256xf32>
    %10 = arith.addf %9, %8 : vector<8x256xf32>
    %11 = arith.divf %9, %10 : vector<8x256xf32>
    %c0_7 = arith.constant 0 : index
    %c0_8 = arith.constant 0 : index
    %c0_9 = arith.constant 0 : index
    %12 = vector.load %arg5[%c0_7, %c0_8, %c0_9] : memref<1x8x256xf32, #tpu.memory_space<vmem>>, vector<1x8x256xf32>
    %13 = vector.shape_cast %12 : vector<1x8x256xf32> to vector<8x256xf32>
    %14 = vector.shape_cast %11 : vector<8x256xf32> to vector<1x8x256xf32>
    tpu.vector_store %arg5[%c0_7, %c0_8, %c0_9], %14 {strides = array<i32>} : memref<1x8x256xf32, #tpu.memory_space<vmem>>, vector<1x8x256xf32>,
    return
  }
  func.func @transform_0(%arg0: i32, %arg1: i32) -> (i32, i32, i32) {
    %c0_i32 = arith.constant 0 : i32
    %c0_i32_0 = arith.constant 0 : i32
    return %arg0, %c0_i32, %arg1 : i32, i32, i32
  }
  func.func @transform_1(%arg0: i32, %arg1: i32) -> (i32, i32) {
    %c0_i32 = arith.constant 0 : i32
    %c0_i32_0 = arith.constant 0 : i32
    %c0_i32_1 = arith.constant 0 : i32
    return %c0_i32, %c0_i32_0 : i32, i32
  }
  func.func @transform_2(%arg0: i32, %arg1: i32) -> (i32, i32) {
    %c0_i32 = arith.constant 0 : i32
    %c0_i32_0 = arith.constant 0 : i32
    %c0_i32_1 = arith.constant 0 : i32
    return %c0_i32, %c0_i32_0 : i32, i32
  }
  func.func @transform_3(%arg0: i32, %arg1: i32) -> (i32, i32, i32) {
    %c0_i32 = arith.constant 0 : i32
    %c0_i32_0 = arith.constant 0 : i32
    return %arg0, %c0_i32, %arg1 : i32, i32, i32
  }
}

</mosaic_0001>

<bundles_post_ra>
// kernel: tpu_custom_call.1
= control target key start
LH: loop header
LB: loop body
LE: loop exit
PB: predicated region body
PF: predicated region fallthrough
CT: control target
= control target key end

     0   :  { %8 = vsyncpa [#allocation3], 0  ;;  %s696_s0 = inlined_call_operand.vmem [shape: f32[2,4,256], index: 0, kind: input, shape index: {}]   ;;  %s697_s1 = inlined_call_operand.vmem [shape: f32[8,4], index: 1, kind: input, shape index: {}]   ;;  %s698_s2 = inlined_call_operand.vmem [shape: f32[8,1], index: 2, kind: input, shape index: {}]   ;;  %s699_s3 = inlined_call_operand.hbm [shape: f32[2,8,256], index: 3, kind: output, shape index: {}]  }
   0x1   :  { %10 = vsyncpa [#allocation3 + $0x1], 0  ;;  %s585_s12 = smov 0   ;;  %s587_s13 = smov 0  }
   0x2   :  { %s589_s14 = smov 0   ;;  %s591_s15 = smov 0  }
   0x3   :  { %s593_s16 = smov 0   ;;  %s595_s17 = smov 0  }
   0x4 LB: > { %s397_s18 = sadd.s32 4294967295, %s560_s17   ;;  %s398_s19 = sadd.s32 4294967294, %s560_s17   ;;  %s560_s17 = sphi %s595_s17, %s16_s17   ;;  %s556_s16 = sphi %s593_s16, %s706_s16   ;;  %s552_s15 = sphi %s591_s15, %s705_s15   ;;  %s548_s14 = sphi %s589_s14, %s704_s14   ;;  %s544_s13 = sphi %s587_s13, %s703_s13   ;;  %s540_s12 = sphi %s585_s12, %s702_s12  }
   0x5   : > { %s28_s20 = sadd.s32 1, %s556_s16  ;;  %s107_s21 = sadd.s32 1, %s548_s14 }
   0x6   : > { %p30_p0 = scmp.ge.s32.totalorder %s28_s20, 2  ;;  %p117_p1 = scmp.ne.s32.totalorder %s548_s14, %s544_s13 }
   0x7   : > { %p118_p2 = scmp.eq.s32.totalorder %s397_s18, 1  ;;  %p123_p3 = scmp.ne.s32.totalorder %s544_s13, %s540_s12 }
   0x8   : > { %s708_s20 = smov (%p30_p0, %s28_s20), 0  ;;  %p124_p5 = scmp.eq.s32.totalorder %s398_s19, 1 }
   0x9   : > { %p625_p4 = por %p118_p2, %p117_p1  ;;  %s102_s23 = ssub.s32 %s556_s16, %s708_s20 }
   0xa   : > { %p401_p6 = scmp.ge.s32.totalorder %s560_s17, 1  ;;  %p105_p7 = scmp.eq.s32.totalorder %s102_s23, 0 }
   0xb   : > { %p632_p8 = por %p124_p5, %p123_p3  ;;  %p161_p9 = scmp.lt.s32.totalorder %s560_s17, 3 }
   0xc   : > { %s638_s25 = scalar_select %p105_p7, %s548_s14, %s107_s21  }
   0xd   : > { %p162_p10 = pnand %p401_p6, %p161_p9 }
   0xe   : > { %p190_p11 = scmp.lt.s32.totalorder (!%p162_p10), %s552_s15, 1  ;;  %s186_s8 = sand.u32 (!%p162_p10), 1, %s544_s13  }
   0xf   : > { %165 = sbr.rel (%p162_p10) target bundleno = 271 (0x10f), region = 32  ;;  %s402_s9 = sshll.u32 (!%p162_p10), %s186_s8, 4 }
  0x10   : > { %s416_s10 = sshll.u32 (!%p162_p10), %s552_s15, 8  ;;  %s188_s11 = scalar_lea.vmem (!%p162_p10), [#allocation2], %s402_s9 }
  0x11   : > { %s321_s18 = sshll.u32 (!%p162_p10), %s188_s11, 4  ;;  %s656_s23 = scalar_lea.hbm (!%p162_p10), %s699_s3, %s416_s10  ;;  %s322_s18 = int_to_ptr.vmem [resolvable:$true] %s321_s18 }
  0x12   : > { %s305_s26 = scalar_lea.sflag (!%p162_p10), [#allocation3], %s186_s8  ;;  %s484_s27 = scalar_lea.vmem (!%p162_p10), %s322_s18, 256 }
  0x13   : > { %p485_p12 = scmp.ne.s32.totalorder (!%p162_p10), %s322_s18, %s484_s27 }
  0x14   : > { %v562_v0 = vmov 0.0   ;;  %v563_v1 = vmov 0   ;;  %v202_v2 = vld [vmem:[%s698_s2] sm:$0xff]  ;;  %s191_s28 = scalar_select %p190_p11, %s552_s15, 1  ;;  %vm214_vm0 = vcmask 1043456   ;;  %vm210_vm1 = vcmask 31744  }
  0x15   : > { %283 = vmatprep.mubr.f32.mxu0 %v562_v0  ;;  %474 = vset.pattern.permute.xlu0 %v563_v1  ;;  %v200_v5 = vld [vmem:[%s697_s1] sm:$0xff]  ;;  %p486_p13 = pnand %p485_p12, %p625_p4 }
  0x16   : > { %205 = vperm.xlu0 %474, %v202_v2   ;;  %s415_s29 = sshll.u32 %s191_s28, 3  ;;  %s564_s28 = smov [#allocation2]  }
  0x17   : > { %s197_s5 = scalar_lea.vmem %s696_s0, %s415_s29  ;;  %p487_p0 = pneg %p486_p13 }
  0x18   : > { %v201_v3 = vld [vmem:[%s197_s5] sm:$0xff]  ;;  %s488_s15 = sshll.u32 %s564_s28, 4  ;;  %s489_s15 = int_to_ptr.vmem [resolvable:$false] %s488_s15 }
  0x19   : > { %v209_v4 = vcombine.high %v201_v3, %v201_v3  ;;  %s490_s29 = scalar_lea.vmem %s489_s15, 512  ;;  %p491_p1 = scmp.lt.s32.totalorder %s322_s18, %s489_s15 }
  0x1a   : > { %p492_p2 = scmp.lt.s32.totalorder %s490_s29, %s484_s27 }
  0x1b   : > { %405 = vmatprep.subr.msk.mxu0 %vm214_vm0, %v209_v4 }
  0x1c   : > { %406 = vmatpush1.msk.msra.mxu0 %vm214_vm0, %v201_v3  ;;  %p493_p3 = por %p492_p2, %p491_p1 }
  0x1d   : > { %407 = vmatmul.mubr.msk.f32.vlgmr.msra.gmra.mxu0 %vm210_vm1, %v200_v5 }
  0x1e   : > { %p494_p5 = pnand %p493_p3, %p487_p0 }
  0x91   : > { %v206_v6 = vpop.permute.xlu0 %205 }
  0xdd   : > { %v285_v7 = vpop.f32.mrf.mxu0 }
  0xde   : > { %v286_v8 = vadd.f32 %v285_v7, %v206_v6 }
  0xdf   : > { %v287_v9 = vpop.f32.mrf.mxu0 }
  0xe0   : > { %v408_v10 = vmul.f32 -1.442695, %v286_v8  ;;  %v288_v11 = vadd.f32 %v287_v9, %v206_v6 }
  0xe2   : > { %476 = vpow2.f32 %v408_v10  ;;  %v409_v12 = vmul.f32 -1.442695, %v288_v11 }
  0xe4   : > { %478 = vpow2.f32 %v409_v12 }
  0xef   : > { %v477_v13 = vpop.eup %476 }
  0xf0   : > { %v296_v14 = vadd.f32 1.0, %v477_v13 }
  0xf1   : > { %v479_v15 = vpop.eup %478 }
  0xf2   : > { %480 = vrcp.f32 %v296_v14  ;;  %v297_v16 = vadd.f32 1.0, %v479_v15 }
  0xf4   : > { %482 = vrcp.f32 %v297_v16 }
  0xff   : > { %v481_v17 = vpop.eup %480 }
 0x100   : > { %302 = vst [vmem:[%s188_s11] sm:$0xff] %v481_v17 }
 0x101   : > { %v483_v18 = vpop.eup %482 }
 0x102   : > { %303 = vst [vmem:[%s188_s11 + $0x8] sm:$0xff] %v483_v18 }
 0x103   : > { %497 = shalt.err (!%p494_p5)
}
 0x104   : > { %s498_s30 = scalar_lea.hbm %s656_s23, 256  ;;  %s502_s6 = scalar_lea.hbm %s699_s3, 512 }
 0x105   : > { %p499_p6 = scmp.ne.s32.totalorder %s656_s23, %s498_s30  ;;  %p503_p10 = scmp.lt.s32.totalorder %s656_s23, %s699_s3 }
 0x106   : > { %p504_p11 = scmp.lt.s32.totalorder %s502_s6, %s498_s30 }
 0x107   : > { %p500_p7 = pnand %p499_p6, %p625_p4 }
 0x108   : > { %p505_p12 = por %p504_p11, %p503_p10 }
 0x109   : > { %p501_p9 = pneg %p500_p7 }
 0x10b   : > { %p506_p13 = pnand %p505_p12, %p501_p9 }
 0x10d   : > { %509 = shalt.err (!%p506_p13)
}
 0x10e   : > { %417 = dma.vmem_to_hbm [thread:$0]  (%p625_p4), %s322_s18, 256, %s656_s23, %s305_s26  }
 0x10f PF: > { %p423_p0 = scmp.ge.s32.totalorder %s560_s17, 2  ;;  %s333_s9 = sand.u32 1, %s540_s12  }
 0x110   : > { %s334_s10 = scalar_lea.sflag [#allocation3], %s333_s9 }
 0x111   : > { %p420_p1 = pnand %p423_p0, %p632_p8 }
 0x113   : > { %p421_p2 = pneg %p420_p1 }
 0x115   : > { %535 = dma.done.wait (%p421_p2), %s334_s10, 256  }
 0x116   : > { %537 = vsyncadd (%p421_p2), %s334_s10, 4294967040  ;;  %s16_s17 = sadd.s32 1, %s560_s17   ;;  %s702_s12 = smov %s544_s13 }
 0x117   : > { %p13_p3 = scmp.ge.s32.totalorder %s16_s17, 4   ;;  %s703_s13 = smov %s548_s14 }
 0x118   : > { %s704_s14 = smov %s638_s25  ;;  %s705_s15 = smov %s556_s16 }
 0x119   : > { %s706_s16 = smov %s708_s20  ;;  %15 = sbr.rel (!%p13_p3) target bundleno = 4 (0x4), region = 67 }
 0x11e   :  { %339 = vsyncpa [#allocation3], 1 }
 0x11f   :  { %341 = vsyncpa [#allocation3 + $0x1], 1 }

</bundles_post_ra>
